<compile_context>
chip_gen: v6e
topology: v6e:2x2x1
jax: 0.10.0
libtpu: 0.0.40
codegen_flags: <defaults>
</compile_context>

<pallas_src>
import functools

import jax
import jax.numpy as jnp
from jax.experimental import pallas as pl
from jax.experimental.pallas import tpu as pltpu


# ---------------------------------------------------------------------------
# In-kernel helpers (operate on VMEM values, fp32)
# ---------------------------------------------------------------------------

def _masked_mean_pool(tok, mask):
    """tok: [tB, S, H] f32, mask: [tB, S] f32 -> pooled [tB, H] f32."""
    m = mask[..., None]                                   # [tB, S, 1]
    summed = jnp.sum(tok * m, axis=1)                     # [tB, H]
    counts = jnp.maximum(jnp.sum(m, axis=1), 1e-9)        # [tB, 1]
    return summed / counts


def _bce_with_logits_sum(x, y):
    """Numerically stable BCE-with-logits, summed over the tile. x, y: [tB, 1]."""
    per_ex = jnp.maximum(x, 0.0) - x * y + jnp.log1p(jnp.exp(-jnp.abs(x)))
    return jnp.sum(per_ex, axis=0, keepdims=True)         # [1, 1]


# ---------------------------------------------------------------------------
# Kernels
# ---------------------------------------------------------------------------

def _ct_kernel_untied(matmul_dtype,
                      tok1_ref, mask1_ref, tok2_ref, mask2_ref,
                      w1_ref, b1_ref, w2_ref, b2_ref, y_ref, out_ref):
    p1 = _masked_mean_pool(tok1_ref[...], mask1_ref[...])
    p2 = _masked_mean_pool(tok2_ref[...], mask2_ref[...])
    # MXU projections in bf16 with fp32 accumulation; bias add in fp32.
    r1 = jnp.dot(p1.astype(matmul_dtype), w1_ref[...].astype(matmul_dtype),
                 preferred_element_type=jnp.float32) + b1_ref[...]
    r2 = jnp.dot(p2.astype(matmul_dtype), w2_ref[...].astype(matmul_dtype),
                 preferred_element_type=jnp.float32) + b2_ref[...]
    x = jnp.sum(r1 * r2, axis=-1, keepdims=True)           # [tB, 1] row-wise dot
    partial = _bce_with_logits_sum(x, y_ref[...])           # [1, 1]
    # Lane-dense per-tile partial (unmasked vst); wrapper reads lane 0.
    out_ref[...] = jnp.broadcast_to(partial, out_ref.shape)


def _ct_kernel_tied(matmul_dtype,
                    tok1_ref, mask1_ref, tok2_ref, mask2_ref,
                    w_ref, b_ref, y_ref, out_ref):
    # Valid only while model1/model2 weights are bit-identical (deepcopy init).
    p1 = _masked_mean_pool(tok1_ref[...], mask1_ref[...])
    p2 = _masked_mean_pool(tok2_ref[...], mask2_ref[...])
    tb = p1.shape[0]
    stacked = jnp.concatenate([p1, p2], axis=0).astype(matmul_dtype)  # [2*tB, H]
    reps = jnp.dot(stacked, w_ref[...].astype(matmul_dtype),
                   preferred_element_type=jnp.float32) + b_ref[...]
    r1 = reps[:tb]
    r2 = reps[tb:]
    x = jnp.sum(r1 * r2, axis=-1, keepdims=True)
    partial = _bce_with_logits_sum(x, y_ref[...])
    out_ref[...] = jnp.broadcast_to(partial, out_ref.shape)


# ---------------------------------------------------------------------------
# Tile sizing / wrapper
# ---------------------------------------------------------------------------

def _choose_batch_tile(B, S, H, D, itemsize, budget_bytes=32 * 1024 * 1024):
    """Largest batch tile (multiple of 8, divisor of B) whose double-buffered
    working set fits the VMEM budget (budget chosen to be safe on v7x 64 MiB)."""
    per_row = (2 * 2 * S * H * itemsize          # 2 token inputs, 2 buffers each
               + 2 * 2 * S * itemsize            # 2 masks, 2 buffers each
               + 4 * (2 * H + 2 * D + 8))        # fp32 intermediates
    cap = max(8, budget_bytes // max(per_row, 1))
    if B <= cap:
        return B
    best = 0
    t = 8
    while t <= min(cap, B):
        if B % t == 0:
            best = t
        t += 8
    if best == 0:
        for t in range(min(cap, B), 0, -1):
            if B % t == 0:
                best = t
                break
    return best


def _vmem_estimate(tb, S, H, D, itemsize):
    tok = 2 * 2 * tb * S * H * itemsize
    msk = 2 * 2 * tb * S * itemsize
    wgt = 2 * 2 * (H * D + D) * 4
    lbl = 2 * tb * 4
    out = 2 * 8 * 128 * 4
    interm = 4 * tb * (2 * H + 2 * D + 8) * 4
    return tok + msk + wgt + lbl + out + interm


def contrastive_tension_loss(tok1, mask1, tok2, mask2, w1, b1, w2, b2, labels,
                             *, tied_weights=False, batch_tile=None,
                             matmul_dtype=jnp.bfloat16):
    """tok*: [B,S,H] f32 token embeddings; mask*: [B,S] f32; w*: [H,D]; b*: [1,D];
    labels: [B,1] f32. Returns scalar BCEWithLogits(reduction='sum') loss."""
    B, S, H = tok1.shape
    D = w1.shape[1]
    itemsize = jnp.dtype(tok1.dtype).itemsize

    tb = batch_tile if batch_tile is not None else _choose_batch_tile(
        B, S, H, D, itemsize)
    assert B % tb == 0, (B, tb)
    num_tiles = B // tb

    tok_spec = pl.BlockSpec((tb, S, H), lambda i: (i, 0, 0))
    mask_spec = pl.BlockSpec((tb, S), lambda i: (i, 0))
    # Grid-invariant index_map -> weights stay VMEM-resident across the grid.
    w_spec = pl.BlockSpec((H, D), lambda i: (0, 0))
    b_spec = pl.BlockSpec((1, D), lambda i: (0, 0))
    y_spec = pl.BlockSpec((tb, 1), lambda i: (i, 0))
    out_spec = pl.BlockSpec((1, 8, 128), lambda i: (i, 0, 0))

    if tied_weights:
        kernel = functools.partial(_ct_kernel_tied, matmul_dtype)
        in_specs = [tok_spec, mask_spec, tok_spec, mask_spec,
                    w_spec, b_spec, y_spec]
        args = (tok1, mask1, tok2, mask2, w1, b1, labels)
        weight_bytes = (H * D + D) * 4
    else:
        kernel = functools.partial(_ct_kernel_untied, matmul_dtype)
        in_specs = [tok_spec, mask_spec, tok_spec, mask_spec,
                    w_spec, b_spec, w_spec, b_spec, y_spec]
        args = (tok1, mask1, tok2, mask2, w1, b1, w2, b2, labels)
        weight_bytes = 2 * (H * D + D) * 4

    vmem_limit = min(max(int(1.5 * _vmem_estimate(tb, S, H, D, itemsize)),
                         16 * 1024 * 1024), 56 * 1024 * 1024)

    cost = pl.CostEstimate(
        flops=int(2 * 2 * B * H * D + 4 * B * S * H + 2 * B * D + 6 * B),
        transcendentals=int(2 * B),
        bytes_accessed=int((2 * B * S * H + 2 * B * S + B) * itemsize
                           + weight_bytes + num_tiles * 8 * 128 * 4),
    )

    partials = pl.pallas_call(
        kernel,
        out_shape=jax.ShapeDtypeStruct((num_tiles, 8, 128), jnp.float32),
        grid=(num_tiles,),
        in_specs=in_specs,
        out_specs=out_spec,
        compiler_params=pltpu.CompilerParams(
            dimension_semantics=("parallel",),
            vmem_limit_bytes=vmem_limit),
        cost_estimate=cost,
    )(*args)

    # Each tile wrote its partial loss broadcast across lanes; take lane 0.
    return jnp.sum(partials[:, 0, 0])


# ---------------------------------------------------------------------------
# Demo / correctness check
# ---------------------------------------------------------------------------

if __name__ == "__main__":
    # TODO(synk): the full SentenceTransformer encoder (tokenizer + transformer
    # stack) is out of scope; the loss head is modeled as masked-mean pooling +
    # dense projection, which is what the loss consumes.
    B, S, H, D = 8, 16, 32, 32
    key = jax.random.PRNGKey(0)
    k1, k2, kw, kb = jax.random.split(key, 4)

    tok1 = jax.random.normal(k1, (B, S, H), dtype=jnp.float32)
    tok2 = jax.random.normal(k2, (B, S, H), dtype=jnp.float32)

    # Variable-length attention masks to exercise the fused masked pooling.
    lengths = jnp.array([16, 12, 8, 16, 10, 16, 4, 13], dtype=jnp.int32)
    pos = jnp.arange(S, dtype=jnp.int32)[None, :]
    mask = (pos < lengths[:, None]).astype(jnp.float32)     # [B, S]

    # Encoder head params. model1 = copy.deepcopy(model2) -> identical at init.
    w2 = jax.random.normal(kw, (H, D), dtype=jnp.float32) / jnp.sqrt(H)
    b2 = jax.random.normal(kb, (1, D), dtype=jnp.float32) * 0.01
    w1, b1 = w2, b2

    # Labels from the CT reader: y_1 = 1 (positive pair), rest 0.
    labels = jnp.zeros((B, 1), dtype=jnp.float32).at[0, 0].set(1.0)

    loss_untied = contrastive_tension_loss(
        tok1, mask, tok2, mask, w1, b1, w2, b2, labels, tied_weights=False)
    loss_tied = contrastive_tension_loss(
        tok1, mask, tok2, mask, w1, b1, w2, b2, labels, tied_weights=True)
    loss_untied, loss_tied = jax.block_until_ready((loss_untied, loss_tied))

    # Pure-JAX reference.
    def ref_pool(tok, m):
        mm = m[..., None]
        return jnp.sum(tok * mm, axis=1) / jnp.maximum(jnp.sum(mm, axis=1), 1e-9)

    def ref_loss(mm_dtype):
        p1 = ref_pool(tok1, mask)
        p2 = ref_pool(tok2, mask)
        r1 = jnp.dot(p1.astype(mm_dtype), w1.astype(mm_dtype),
                     preferred_element_type=jnp.float32) + b1
        r2 = jnp.dot(p2.astype(mm_dtype), w2.astype(mm_dtype),
                     preferred_element_type=jnp.float32) + b2
        x = jnp.sum(r1 * r2, axis=-1)
        y = labels[:, 0]
        return jnp.sum(jnp.maximum(x, 0.0) - x * y + jnp.log1p(jnp.exp(-jnp.abs(x))))

    ref_bf16 = ref_loss(jnp.bfloat16)   # same matmul precision as the kernel
    ref_f32 = ref_loss(jnp.float32)     # full-precision semantics check

    assert jnp.allclose(loss_untied, ref_bf16, rtol=1e-3, atol=1e-3), (loss_untied, ref_bf16)
    assert jnp.allclose(loss_tied, ref_bf16, rtol=1e-3, atol=1e-3), (loss_tied, ref_bf16)
    assert jnp.allclose(loss_untied, ref_f32, rtol=5e-2, atol=5e-2), (loss_untied, ref_f32)
    assert jnp.allclose(loss_tied, ref_f32, rtol=5e-2, atol=5e-2), (loss_tied, ref_f32)

    print("KERNEL_OK")
</pallas_src>

<mosaic_0001>
module attributes {stable_mosaic.version = 11 : i64} {
  func.func @_ct_kernel_untied(%arg0: i32, %arg1: memref<8x16x32xf32, #tpu.memory_space<vmem>>, %arg2: memref<8x16xf32, #tpu.memory_space<vmem>>, %arg3: memref<8x16x32xf32, #tpu.memory_space<vmem>>, %arg4: memref<8x16xf32, #tpu.memory_space<vmem>>, %arg5: memref<32x32xf32, #tpu.memory_space<vmem>>, %arg6: memref<1x32xf32, #tpu.memory_space<vmem>>, %arg7: memref<32x32xf32, #tpu.memory_space<vmem>>, %arg8: memref<1x32xf32, #tpu.memory_space<vmem>>, %arg9: memref<8x1xf32, #tpu.memory_space<vmem>>, %arg10: memref<1x8x128xf32, #tpu.memory_space<vmem>>) attributes {dimension_semantics = [#tpu.dimension_semantics<parallel>], iteration_bounds = array<i64: 1>, scalar_prefetch = 0 : i64, scratch_operands = 0 : i64, tpu.core_type = #tpu.core_type<tc>, window_params = [{transform_indices = @transform_0, window_bounds = array<i64: 8, 16, 32>}, {transform_indices = @transform_1, window_bounds = array<i64: 8, 16>}, {transform_indices = @transform_2, window_bounds = array<i64: 8, 16, 32>}, {transform_indices = @transform_3, window_bounds = array<i64: 8, 16>}, {pipeline_mode = #tpu.pipeline_mode<synchronous>, transform_indices = @transform_4, window_bounds = array<i64: 32, 32>}, {pipeline_mode = #tpu.pipeline_mode<synchronous>, transform_indices = @transform_5, window_bounds = array<i64: 1, 32>}, {pipeline_mode = #tpu.pipeline_mode<synchronous>, transform_indices = @transform_6, window_bounds = array<i64: 32, 32>}, {pipeline_mode = #tpu.pipeline_mode<synchronous>, transform_indices = @transform_7, window_bounds = array<i64: 1, 32>}, {transform_indices = @transform_8, window_bounds = array<i64: 8, 1>}, {transform_indices = @transform_9, window_bounds = array<i64: 1, 8, 128>}]} {
    %c0 = arith.constant 0 : index
    %c0_0 = arith.constant 0 : index
    %c0_1 = arith.constant 0 : index
    %0 = vector.load %arg1[%c0, %c0_0, %c0_1] : memref<8x16x32xf32, #tpu.memory_space<vmem>>, vector<8x16x32xf32>
    %c0_2 = arith.constant 0 : index
    %c0_3 = arith.constant 0 : index
    %1 = vector.load %arg2[%c0_2, %c0_3] : memref<8x16xf32, #tpu.memory_space<vmem>>, vector<8x16xf32>
    %2 = vector.shape_cast %1 : vector<8x16xf32> to vector<8x16x1xf32>
    %3 = vector.broadcast %2 : vector<8x16x1xf32> to vector<8x16x32xf32>
    %4 = arith.mulf %0, %3 : vector<8x16x32xf32>
    %cst = arith.constant dense<0.000000e+00> : vector<8x32xf32>
    %5 = vector.multi_reduction <add>, %4, %cst [1] : vector<8x16x32xf32> to vector<8x32xf32>
    %cst_4 = arith.constant dense<0.000000e+00> : vector<8x1xf32>
    %6 = vector.multi_reduction <add>, %2, %cst_4 [1] : vector<8x16x1xf32> to vector<8x1xf32>
    %cst_5 = arith.constant 9.99999971E-10 : f32
    %7 = vector.broadcast %cst_5 : f32 to vector<8x1xf32>
    %8 = arith.maximumf %6, %7 : vector<8x1xf32>
    %9 = vector.broadcast %8 : vector<8x1xf32> to vector<8x32xf32>
    %10 = arith.divf %5, %9 : vector<8x32xf32>
    %c0_6 = arith.constant 0 : index
    %c0_7 = arith.constant 0 : index
    %c0_8 = arith.constant 0 : index
    %11 = vector.load %arg3[%c0_6, %c0_7, %c0_8] : memref<8x16x32xf32, #tpu.memory_space<vmem>>, vector<8x16x32xf32>
    %c0_9 = arith.constant 0 : index
    %c0_10 = arith.constant 0 : index
    %12 = vector.load %arg4[%c0_9, %c0_10] : memref<8x16xf32, #tpu.memory_space<vmem>>, vector<8x16xf32>
    %13 = vector.shape_cast %12 : vector<8x16xf32> to vector<8x16x1xf32>
    %14 = vector.broadcast %13 : vector<8x16x1xf32> to vector<8x16x32xf32>
    %15 = arith.mulf %11, %14 : vector<8x16x32xf32>
    %cst_11 = arith.constant dense<0.000000e+00> : vector<8x32xf32>
    %16 = vector.multi_reduction <add>, %15, %cst_11 [1] : vector<8x16x32xf32> to vector<8x32xf32>
    %cst_12 = arith.constant dense<0.000000e+00> : vector<8x1xf32>
    %17 = vector.multi_reduction <add>, %13, %cst_12 [1] : vector<8x16x1xf32> to vector<8x1xf32>
    %cst_13 = arith.constant 9.99999971E-10 : f32
    %18 = vector.broadcast %cst_13 : f32 to vector<8x1xf32>
    %19 = arith.maximumf %17, %18 : vector<8x1xf32>
    %20 = vector.broadcast %19 : vector<8x1xf32> to vector<8x32xf32>
    %21 = arith.divf %16, %20 : vector<8x32xf32>
    %22 = arith.truncf %10 : vector<8x32xf32> to vector<8x32xbf16>
    %c0_14 = arith.constant 0 : index
    %c0_15 = arith.constant 0 : index
    %23 = vector.load %arg5[%c0_14, %c0_15] : memref<32x32xf32, #tpu.memory_space<vmem>>, vector<32x32xf32>
    %24 = arith.truncf %23 : vector<32x32xf32> to vector<32x32xbf16>
    %cst_16 = arith.constant dense<0.000000e+00> : vector<8x32xf32>
    %25 = tpu.matmul %22, %24, %cst_16 {dimension_numbers = #tpu.dot_dimension_numbers<[1], [0], [0], [1], [0, 0, 1, 1], [], []>} : vector<8x32xbf16>, vector<32x32xbf16>, vector<8x32xf32> -> vector<8x32xf32>
    %c0_17 = arith.constant 0 : index
    %c0_18 = arith.constant 0 : index
    %26 = vector.load %arg6[%c0_17, %c0_18] : memref<1x32xf32, #tpu.memory_space<vmem>>, vector<1x32xf32>
    %27 = vector.broadcast %26 : vector<1x32xf32> to vector<8x32xf32>
    %28 = arith.addf %25, %27 : vector<8x32xf32>
    %29 = arith.truncf %21 : vector<8x32xf32> to vector<8x32xbf16>
    %c0_19 = arith.constant 0 : index
    %c0_20 = arith.constant 0 : index
    %30 = vector.load %arg7[%c0_19, %c0_20] : memref<32x32xf32, #tpu.memory_space<vmem>>, vector<32x32xf32>
    %31 = arith.truncf %30 : vector<32x32xf32> to vector<32x32xbf16>
    %cst_21 = arith.constant dense<0.000000e+00> : vector<8x32xf32>
    %32 = tpu.matmul %29, %31, %cst_21 {dimension_numbers = #tpu.dot_dimension_numbers<[1], [0], [0], [1], [0, 0, 1, 1], [], []>} : vector<8x32xbf16>, vector<32x32xbf16>, vector<8x32xf32> -> vector<8x32xf32>
    %c0_22 = arith.constant 0 : index
    %c0_23 = arith.constant 0 : index
    %33 = vector.load %arg8[%c0_22, %c0_23] : memref<1x32xf32, #tpu.memory_space<vmem>>, vector<1x32xf32>
    %34 = vector.broadcast %33 : vector<1x32xf32> to vector<8x32xf32>
    %35 = arith.addf %32, %34 : vector<8x32xf32>
    %36 = arith.mulf %28, %35 : vector<8x32xf32>
    %cst_24 = arith.constant dense<0.000000e+00> : vector<8xf32>
    %37 = vector.multi_reduction <add>, %36, %cst_24 [1] : vector<8x32xf32> to vector<8xf32>
    %38 = vector.shape_cast %37 : vector<8xf32> to vector<8x1xf32>
    %c0_25 = arith.constant 0 : index
    %c0_26 = arith.constant 0 : index
    %39 = vector.load %arg9[%c0_25, %c0_26] : memref<8x1xf32, #tpu.memory_space<vmem>>, vector<8x1xf32>
    %cst_27 = arith.constant 0.000000e+00 : f32
    %40 = vector.broadcast %cst_27 : f32 to vector<8x1xf32>
    %41 = arith.maximumf %38, %40 : vector<8x1xf32>
    %42 = arith.mulf %38, %39 : vector<8x1xf32>
    %43 = arith.subf %41, %42 : vector<8x1xf32>
    %44 = math.absf %38 : vector<8x1xf32>
    %cst_28 = arith.constant 0.000000e+00 : f32
    %45 = vector.broadcast %cst_28 : f32 to vector<8x1xf32>
    %46 = arith.subf %45, %44 : vector<8x1xf32>
    %47 = math.exp %46 : vector<8x1xf32>
    %48 = math.log1p %47 : vector<8x1xf32>
    %49 = arith.addf %43, %48 : vector<8x1xf32>
    %cst_29 = arith.constant dense<0.000000e+00> : vector<1xf32>
    %50 = vector.multi_reduction <add>, %49, %cst_29 [0] : vector<8x1xf32> to vector<1xf32>
    %51 = vector.shape_cast %50 : vector<1xf32> to vector<1x1xf32>
    %52 = vector.shape_cast %51 : vector<1x1xf32> to vector<1x1x1xf32>
    %53 = vector.broadcast %52 : vector<1x1x1xf32> to vector<1x8x128xf32>
    %c0_30 = arith.constant 0 : index
    %c0_31 = arith.constant 0 : index
    %c0_32 = arith.constant 0 : index
    %54 = vector.load %arg10[%c0_30, %c0_31, %c0_32] : memref<1x8x128xf32, #tpu.memory_space<vmem>>, vector<1x8x128xf32>
    tpu.vector_store %arg10[%c0_30, %c0_31, %c0_32], %53 {strides = array<i32>} : memref<1x8x128xf32, #tpu.memory_space<vmem>>, vector<1x8x128xf32>,
    return
  }
  func.func @transform_0(%arg0: i32) -> (i32, i32, i32) {
    %c0_i32 = arith.constant 0 : i32
    %c0_i32_0 = arith.constant 0 : i32
    %c0_i32_1 = arith.constant 0 : i32
    return %arg0, %c0_i32, %c0_i32_0 : i32, i32, i32
  }
  func.func @transform_1(%arg0: i32) -> (i32, i32) {
    %c0_i32 = arith.constant 0 : i32
    %c0_i32_0 = arith.constant 0 : i32
    return %arg0, %c0_i32 : i32, i32
  }
  func.func @transform_2(%arg0: i32) -> (i32, i32, i32) {
    %c0_i32 = arith.constant 0 : i32
    %c0_i32_0 = arith.constant 0 : i32
    %c0_i32_1 = arith.constant 0 : i32
    return %arg0, %c0_i32, %c0_i32_0 : i32, i32, i32
  }
  func.func @transform_3(%arg0: i32) -> (i32, i32) {
    %c0_i32 = arith.constant 0 : i32
    %c0_i32_0 = arith.constant 0 : i32
    return %arg0, %c0_i32 : i32, i32
  }
  func.func @transform_4(%arg0: i32) -> (i32, i32) {
    %c0_i32 = arith.constant 0 : i32
    %c0_i32_0 = arith.constant 0 : i32
    %c0_i32_1 = arith.constant 0 : i32
    return %c0_i32, %c0_i32_0 : i32, i32
  }
  func.func @transform_5(%arg0: i32) -> (i32, i32) {
    %c0_i32 = arith.constant 0 : i32
    %c0_i32_0 = arith.constant 0 : i32
    %c0_i32_1 = arith.constant 0 : i32
    return %c0_i32, %c0_i32_0 : i32, i32
  }
  func.func @transform_6(%arg0: i32) -> (i32, i32) {
    %c0_i32 = arith.constant 0 : i32
    %c0_i32_0 = arith.constant 0 : i32
    %c0_i32_1 = arith.constant 0 : i32
    return %c0_i32, %c0_i32_0 : i32, i32
  }
  func.func @transform_7(%arg0: i32) -> (i32, i32) {
    %c0_i32 = arith.constant 0 : i32
    %c0_i32_0 = arith.constant 0 : i32
    %c0_i32_1 = arith.constant 0 : i32
    return %c0_i32, %c0_i32_0 : i32, i32
  }
  func.func @transform_8(%arg0: i32) -> (i32, i32) {
    %c0_i32 = arith.constant 0 : i32
    %c0_i32_0 = arith.constant 0 : i32
    return %arg0, %c0_i32 : i32, i32
  }
  func.func @transform_9(%arg0: i32) -> (i32, i32, i32) {
    %c0_i32 = arith.constant 0 : i32
    %c0_i32_0 = arith.constant 0 : i32
    %c0_i32_1 = arith.constant 0 : i32
    return %arg0, %c0_i32, %c0_i32_0 : i32, i32, i32
  }
}

</mosaic_0001>

<bundles_post_ra>
// kernel: tpu_custom_call.1
= control target key start
LH: loop header
LB: loop body
LE: loop exit
PB: predicated region body
PF: predicated region fallthrough
CT: control target
= control target key end

     0   :  { %14 = vsyncpa [#allocation3], 0  ;;  %s1338_s0 = inlined_call_operand.hbm [shape: f32[8,16,32], index: 0, kind: input, shape index: {}]   ;;  %s1339_s1 = inlined_call_operand.vmem [shape: f32[8,16], index: 1, kind: input, shape index: {}]   ;;  %s1340_s2 = inlined_call_operand.hbm [shape: f32[8,16,32], index: 2, kind: input, shape index: {}]   ;;  %s1341_s3 = inlined_call_operand.hbm [shape: f32[8,16], index: 3, kind: input, shape index: {}]   ;;  %s1342_s4 = inlined_call_operand.hbm [shape: f32[32,32], index: 4, kind: input, shape index: {}]   ;;  %s1343_s5 = inlined_call_operand.vmem [shape: f32[1,32], index: 5, kind: input, shape index: {}]   ;;  %s1344_s6 = inlined_call_operand.hbm [shape: f32[32,32], index: 6, kind: input, shape index: {}]   ;;  %s1345_s7 = inlined_call_operand.vmem [shape: f32[1,32], index: 7, kind: input, shape index: {}]   ;;  %s1346_s8 = inlined_call_operand.vmem [shape: f32[8,1], index: 8, kind: input, shape index: {}]   ;;  %s1347_s9 = inlined_call_operand.hbm [shape: f32[1,8,128], index: 9, kind: output, shape index: {}]  }
   0x1   :  { %15 = vsyncpa [#allocation6], 0 }
   0x2   :  { %16 = vsyncpa [#allocation9], 0 }
   0x3   :  { %17 = vsyncpa [#allocation4], 0  ;;  %s1086_s30 = smov [#allocation5]   ;;  %s1087_s11 = smov [#allocation8]  }
   0x4   :  { %s37_s10 = sshll.u32 %s1086_s30, 4  ;;  %s59_s12 = sshll.u32 %s1087_s11, 4  ;;  %s38_s10 = int_to_ptr.vmem [resolvable:$true] %s37_s10  ;;  %s60_s12 = int_to_ptr.vmem [resolvable:$true] %s59_s12 }
   0x5   :  { %s966_s13 = scalar_lea.vmem %s38_s10, 2048  ;;  %p971_p1 = scmp.lt.s32.totalorder %s38_s10, %s38_s10 }
   0x6   :  { %p967_p0 = scmp.ne.s32.totalorder %s38_s10, %s966_s13  ;;  %p972_p2 = scmp.lt.s32.totalorder %s966_s13, %s966_s13 }
   0x8   :  { %p973_p3 = por %p972_p2, %p971_p1 }
   0xa   :  { %p974_p4 = pnand %p973_p3, %p967_p0 }
   0xc   :  { %977 = shalt.err (!%p974_p4)
}
   0xd   :  { %s1088_s14 = smov 128   ;;  %s1089_s15 = smov 8  }
   0xe   :  { %43 = dma.hbm_to_vmem [thread:$0]  %s1340_s2, 2048, %s38_s10, [#allocation6], %s1088_s14, %s1088_s14, %s1089_s15  }
   0xf   :  { %s986_s18 = scalar_lea.vmem %s60_s12, 512  ;;  %p991_p6 = scmp.lt.s32.totalorder %s60_s12, %s60_s12 }
  0x10   :  { %p987_p5 = scmp.ne.s32.totalorder %s60_s12, %s986_s18  ;;  %p992_p7 = scmp.lt.s32.totalorder %s986_s18, %s986_s18 }
  0x12   :  { %p993_p8 = por %p992_p7, %p991_p6 }
  0x14   :  { %p994_p9 = pnand %p993_p8, %p987_p5 }
  0x16   :  { %997 = shalt.err (!%p994_p9)
}
  0x17   :  { %65 = dma.hbm_to_vmem [thread:$0]  %s1342_s4, 512, %s60_s12, [#allocation9], %s1088_s14, %s1088_s14, %s1089_s15  }
  0x18   :  { %s1090_s21 = smov [#allocation2]   ;;  %s1091_s23 = smov [#allocation7]  }
  0x19   :  { %s23_s22 = sshll.u32 %s1090_s21, 4  ;;  %s50_s24 = sshll.u32 %s1091_s23, 4  ;;  %s24_s22 = int_to_ptr.vmem [resolvable:$true] %s23_s22  ;;  %s51_s24 = int_to_ptr.vmem [resolvable:$true] %s50_s24 }
  0x1a   :  { %s1006_s2 = scalar_lea.vmem %s24_s22, 2048  ;;  %p1011_p11 = scmp.lt.s32.totalorder %s24_s22, %s24_s22 }
  0x1b   :  { %p1007_p10 = scmp.ne.s32.totalorder %s24_s22, %s1006_s2  ;;  %p1012_p12 = scmp.lt.s32.totalorder %s1006_s2, %s1006_s2 }
  0x1d   :  { %p1013_p13 = por %p1012_p12, %p1011_p11 }
  0x1f   :  { %p1014_p0 = pnand %p1013_p13, %p1007_p10 }
  0x21   :  { %1017 = shalt.err (!%p1014_p0)
}
  0x22   :  { %29 = dma.hbm_to_vmem [thread:$0]  %s1338_s0, 2048, %s24_s22, [#allocation3], %s1088_s14, %s1088_s14, %s1089_s15  }
  0x23   :  { %s1026_s4 = scalar_lea.vmem %s51_s24, 128  ;;  %p1031_p2 = scmp.lt.s32.totalorder %s51_s24, %s51_s24 }
  0x24   :  { %p1027_p1 = scmp.ne.s32.totalorder %s51_s24, %s1026_s4  ;;  %p1032_p3 = scmp.lt.s32.totalorder %s1026_s4, %s1026_s4 }
  0x26   :  { %p1033_p4 = por %p1032_p3, %p1031_p2 }
  0x28   :  { %p1034_p5 = pnand %p1033_p4, %p1027_p1 }
  0x2a   :  { %1037 = shalt.err (!%p1034_p5)
}
  0x2b   :  { %53 = dma.hbm_to_vmem [thread:$0]  %s1341_s3, 128, %s51_s24, [#allocation6]  }
  0x2c   :  { %s1092_s29 = smov [#allocation10]  }
  0x2d   :  { %s73_s30 = sshll.u32 %s1092_s29, 4  ;;  %s74_s30 = int_to_ptr.vmem [resolvable:$true] %s73_s30 }
  0x2e   :  { %s1046_s10 = scalar_lea.vmem %s74_s30, 512  ;;  %p1051_p7 = scmp.lt.s32.totalorder %s74_s30, %s74_s30 }
  0x2f   :  { %p1047_p6 = scmp.ne.s32.totalorder %s74_s30, %s1046_s10  ;;  %p1052_p8 = scmp.lt.s32.totalorder %s1046_s10, %s1046_s10 }
  0x31   :  { %p1053_p9 = por %p1052_p8, %p1051_p7 }
  0x33   :  { %p1054_p10 = pnand %p1053_p9, %p1047_p6 }
  0x35   :  { %1057 = shalt.err (!%p1054_p10)
}
  0x36   :  { %79 = dma.hbm_to_vmem [thread:$0]  %s1344_s6, 512, %s74_s30, [#allocation9], %s1088_s14, %s1088_s14, %s1089_s15  }
  0x37   :  { %1078 = dma.done.wait [#allocation3], 2048  }
  0x38   :  { %1079 = vsyncadd [#allocation3], 4294965248 }
  0x39   :  { %1080 = dma.done.wait [#allocation6], 2176  }
  0x3a   :  { %1081 = vsyncadd [#allocation6], 4294965120 }
  0x3b   :  { %1082 = dma.done.wait [#allocation9], 1024  }
  0x3c   :  { %1083 = vsyncadd [#allocation9], 4294966272  ;;  %v117_v0 = vlaneseq  ;;  %v116_v4 = vld [vmem:[%s1339_s1] sm:$0xff]  ;;  %v657_v28 = vld [vmem:[#allocation8 + $0x10] sm:$0xff]  ;;  %v1093_v31 = vmov 0.0   ;;  %vm1094_vm0 = vmmov 0  }
  0x3d   :  { %v390_v7 = vld [vmem:[#allocation7] sm:$0xff]  ;;  %893 = vmatprep.subr.bf16.mxu0 %v1093_v31  ;;  %901 = vmatprep.subr.bf16.mxu1 %v1093_v31  ;;  %v655_v32 = vld [vmem:[#allocation8] sm:$0xff]  ;;  %v656_v33 = vld [vmem:[#allocation8 + $0x8] sm:$0xff]  ;;  %vm221_vm1 = vcmask 261120   ;;  %vm684_vm2 = vcmask 1041409   ;;  %vm686_vm3 = vcmask 1042434  }
  0x3e   :  { %v118_v1 = vshrl.u32 %v117_v0, 7  ;;  %v658_v29 = vld [vmem:[#allocation8 + $0x18] sm:$0xff]  ;;  %v752_v34 = vld [vmem:[#allocation10 + $0x10] sm:$0xff]  ;;  %v659_v35 = vpack.c.bf16 %v656_v33, %v655_v32  ;;  %897 = vmatprep.mubr.msk.bf16.mxu0 %vm1094_vm0, %v1093_v31  ;;  %905 = vmatprep.mubr.msk.bf16.mxu1 %vm1094_vm0, %v1093_v31  ;;  %v750_v38 = vld [vmem:[#allocation10] sm:$0xff]  ;;  %vm688_vm4 = vcmask 1043459   ;;  %vm690_vm5 = vcmask 1044484  }
  0x3f   :  { %v660_v30 = vpack.c.bf16 %v658_v29, %v657_v28  ;;  %v753_v36 = vld [vmem:[#allocation10 + $0x18] sm:$0xff]  ;;  %v751_v39 = vld [vmem:[#allocation10 + $0x8] sm:$0xff]  ;;  %v103_v50 = vld [vmem:[#allocation2 + $0x18] sm:$0xff]  ;;  %vm692_vm6 = vcmask 1045509   ;;  %vm694_vm7 = vcmask 1046534   ;;  %vm696_vm8 = vcmask 1047559  }
  0x40   :  { %v130_v2 = vsub.s32 1, %v118_v1  ;;  %v119_v3 = vsub.s32 0, %v118_v1  ;;  %v141_v10 = vsub.s32 2, %v118_v1  ;;  %v152_v13 = vsub.s32 3, %v118_v1  ;;  %v101_v52 = vld [vmem:[#allocation2 + $0x8] sm:$0xff]  ;;  %v102_v56 = vld [vmem:[#allocation2 + $0x10] sm:$0xff] }
  0x41   :  { %v163_v16 = vsub.s32 4, %v118_v1  ;;  %v174_v19 = vsub.s32 5, %v118_v1  ;;  %v185_v22 = vsub.s32 6, %v118_v1  ;;  %v196_v25 = vsub.s32 7, %v118_v1  ;;  %894 = vmatpush3.bf16.msra.mxu0 %v660_v30  ;;  %v100_v57 = vld [vmem:[#allocation2] sm:$0xff]  ;;  %v375_v60 = vld [vmem:[#allocation5 + $0x8] sm:$0xff] }
  0x42   :  { %v131_v5 = vrot.slane %v116_v4, %v130_v2  ;;  %v120_v6 = vrot.slane %v116_v4, %v119_v3  ;;  %v394_v8 = vrot.slane %v390_v7, %v119_v3  ;;  %v405_v9 = vrot.slane %v390_v7, %v130_v2  ;;  %895 = vmatprep.subr.bf16.mxu0 %v1093_v31  ;;  %v374_v61 = vld [vmem:[#allocation5] sm:$0xff] }
  0x43   :  { %v142_v11 = vrot.slane %v116_v4, %v141_v10  ;;  %v416_v12 = vrot.slane %v390_v7, %v141_v10  ;;  %v153_v14 = vrot.slane %v116_v4, %v152_v13  ;;  %v427_v15 = vrot.slane %v390_v7, %v152_v13 }
  0x44   :  { %133 = vbcast.lane.b32.xlu1 %v131_v5, 256  ;;  %122 = vbcast.lane.b32.xlu0 %v120_v6, 256  ;;  %v164_v17 = vrot.slane %v116_v4, %v163_v16  ;;  %v438_v18 = vrot.slane %v390_v7, %v163_v16  ;;  %v175_v20 = vrot.slane %v116_v4, %v174_v19  ;;  %vm852_vm10 = vcmask 7168  }
  0x45   :  { %v449_v21 = vrot.slane %v390_v7, %v174_v19  ;;  %v186_v23 = vrot.slane %v116_v4, %v185_v22  ;;  %v460_v24 = vrot.slane %v390_v7, %v185_v22  ;;  %v197_v26 = vrot.slane %v116_v4, %v196_v25  ;;  %896 = vmatpush3.bf16.msra.mxu0 %v659_v35  ;;  %v377_v4 = vld [vmem:[#allocation5 + $0x18] sm:$0xff] }
  0x46   :  { %v471_v27 = vrot.slane %v390_v7, %v196_v25  ;;  %v755_v37 = vpack.c.bf16 %v753_v36, %v752_v34  ;;  %v754_v40 = vpack.c.bf16 %v751_v39, %v750_v38  ;;  %v105_v25 = vld [vmem:[#allocation2 + $0x28] sm:$0xff] }
  0x48   :  { %137 = vbcast.lane.b32.xlu1 %v131_v5, 264  ;;  %126 = vbcast.lane.b32.xlu0 %v120_v6, 264  ;;  %v376_v5 = vld [vmem:[#allocation5 + $0x10] sm:$0xff] }
  0x49   :  { %902 = vmatpush3.bf16.msra.mxu1 %v755_v37 }
  0x4a   :  { %903 = vmatprep.subr.bf16.mxu1 %v1093_v31 }
  0x4c   :  { %400 = vbcast.lane.b32.xlu1 %v394_v8, 264  ;;  %396 = vbcast.lane.b32.xlu0 %v394_v8, 256 }
  0x4d   :  { %904 = vmatpush3.bf16.msra.mxu1 %v754_v40 }
  0x50   :  { %411 = vbcast.lane.b32.xlu1 %v405_v9, 264  ;;  %407 = vbcast.lane.b32.xlu0 %v405_v9, 256 }
  0x54   :  { %148 = vbcast.lane.b32.xlu1 %v142_v11, 264  ;;  %144 = vbcast.lane.b32.xlu0 %v142_v11, 256 }
  0x58   :  { %422 = vbcast.lane.b32.xlu1 %v416_v12, 264  ;;  %418 = vbcast.lane.b32.xlu0 %v416_v12, 256 }
  0x5c   :  { %159 = vbcast.lane.b32.xlu1 %v153_v14, 264  ;;  %155 = vbcast.lane.b32.xlu0 %v153_v14, 256 }
  0x60   :  { %433 = vbcast.lane.b32.xlu1 %v427_v15, 264  ;;  %429 = vbcast.lane.b32.xlu0 %v427_v15, 256 }
  0x64   :  { %170 = vbcast.lane.b32.xlu1 %v164_v17, 264  ;;  %166 = vbcast.lane.b32.xlu0 %v164_v17, 256 }
  0x68   :  { %444 = vbcast.lane.b32.xlu1 %v438_v18, 264  ;;  %440 = vbcast.lane.b32.xlu0 %v438_v18, 256 }
  0x6c   :  { %181 = vbcast.lane.b32.xlu1 %v175_v20, 264  ;;  %177 = vbcast.lane.b32.xlu0 %v175_v20, 256 }
  0x70   :  { %455 = vbcast.lane.b32.xlu1 %v449_v21, 264  ;;  %451 = vbcast.lane.b32.xlu0 %v449_v21, 256 }
  0x74   :  { %192 = vbcast.lane.b32.xlu1 %v186_v23, 264  ;;  %188 = vbcast.lane.b32.xlu0 %v186_v23, 256 }
  0x78   :  { %466 = vbcast.lane.b32.xlu1 %v460_v24, 264  ;;  %462 = vbcast.lane.b32.xlu0 %v460_v24, 256 }
  0x7c   :  { %203 = vbcast.lane.b32.xlu1 %v197_v26, 264  ;;  %199 = vbcast.lane.b32.xlu0 %v197_v26, 256  ;;  %v104_v26 = vld [vmem:[#allocation2 + $0x20] sm:$0xff] }
  0x80   :  { %477 = vbcast.lane.b32.xlu1 %v471_v27, 264  ;;  %473 = vbcast.lane.b32.xlu0 %v471_v27, 256 }
  0xb6   :  { %v134_v41 = vpop.permute.xlu1 %133  ;;  %v123_v42 = vpop.permute.xlu0 %122 }
  0xb7   :  { %v207_v2 = vmul.f32 %v134_v41, %v102_v56  ;;  %v205_v3 = vmul.f32 %v123_v42, %v100_v57 }
  0xb9   :  { %v231_v16 = vsel %vm221_vm1, %v207_v2, 0.0  ;;  %v222_v17 = vsel %vm221_vm1, %v205_v3, 0.0 }
  0xba   :  { %v138_v43 = vpop.permute.xlu1 %137  ;;  %v127_v44 = vpop.permute.xlu0 %126 }
  0xbb   :  { %v301_v45 = vadd.f32 %v138_v43, %v134_v41  ;;  %v294_v47 = vadd.f32 %v127_v44, %v123_v42  ;;  %v208_v58 = vmul.f32 %v138_v43, %v103_v50  ;;  %v206_v59 = vmul.f32 %v127_v44, %v101_v52 }
  0xbd   :  { %v302_v46 = vrot.slane %v301_v45, 4  ;;  %v295_v53 = vrot.slane %v294_v47, 4  ;;  %v232_v9 = vsel %vm221_vm1, %v208_v58, 0.0  ;;  %v223_v10 = vsel %vm221_vm1, %v206_v59, 0.0 }
  0xbe   :  { %v401_v48 = vpop.permute.xlu1 %400  ;;  %v397_v49 = vpop.permute.xlu0 %396  ;;  %v233_v23 = vadd.f32 %v232_v9, %v231_v16  ;;  %v224_v24 = vadd.f32 %v223_v10, %v222_v17  ;;  %v107_v10 = vld [vmem:[#allocation2 + $0x38] sm:$0xff] }
  0xbf   :  { %v303_v51 = vadd.f32 %v302_v46, %v301_v45  ;;  %v296_v63 = vadd.f32 %v295_v53, %v294_v47  ;;  %v480_v6 = vmul.f32 %v401_v48, %v375_v60  ;;  %v479_v7 = vmul.f32 %v397_v49, %v374_v61  ;;  %v379_v61 = vld [vmem:[#allocation5 + $0x28] sm:$0xff] }
  0xc0   :  { %v567_v8 = vadd.f32 %v401_v48, %v397_v49  ;;  %v234_v37 = vrot.slane %v233_v23, 4  ;;  %v225_v38 = vrot.slane %v224_v24, 4 }
  0xc1   :  { %v304_v62 = vrot.slane %v303_v51, 2  ;;  %v297_v12 = vrot.slane %v296_v63, 2  ;;  %v496_v19 = vsel %vm221_vm1, %v480_v6, 0.0  ;;  %v495_v20 = vsel %vm221_vm1, %v479_v7, 0.0 }
  0xc2   :  { %v412_v54 = vpop.permute.xlu1 %411  ;;  %v408_v55 = vpop.permute.xlu0 %407  ;;  %v568_v21 = vrot.slane %v567_v8, 4  ;;  %v497_v32 = vadd.f32 %v496_v19, %v495_v20  ;;  %v235_v49 = vadd.f32 %v234_v37, %v233_v23  ;;  %v226_v50 = vadd.f32 %v225_v38, %v224_v24 }
  0xc3   :  { %v305_v11 = vadd.f32 %v304_v62, %v303_v51  ;;  %v482_v13 = vmul.f32 %v412_v54, %v377_v4  ;;  %v481_v14 = vmul.f32 %v408_v55, %v376_v5  ;;  %v574_v22 = vadd.f32 %v412_v54, %v408_v55  ;;  %v378_v62 = vld [vmem:[#allocation5 + $0x20] sm:$0xff] }
  0xc4   :  { %v298_v28 = vadd.f32 %v297_v12, %v296_v63  ;;  %v569_v33 = vadd.f32 %v568_v21, %v567_v8  ;;  %v498_v43 = vrot.slane %v497_v32, 4  ;;  %v236_v63 = vrot.slane %v235_v49, 2 }
  0xc5   :  { %v306_v27 = vrot.slane %v305_v11, 1  ;;  %v505_v29 = vsel %vm221_vm1, %v482_v13, 0.0  ;;  %v504_v30 = vsel %vm221_vm1, %v481_v14, 0.0  ;;  %v575_v34 = vrot.slane %v574_v22, 4 }
  0xc6   :  { %v149_v0 = vpop.permute.xlu1 %148  ;;  %v145_v1 = vpop.permute.xlu0 %144  ;;  %v506_v39 = vadd.f32 %v505_v29, %v504_v30  ;;  %v299_v42 = vrot.slane %v298_v28, 1  ;;  %v570_v44 = vrot.slane %v569_v33, 2  ;;  %v499_v58 = vadd.f32 %v498_v43, %v497_v32 }
  0xc7   :  { %v210_v35 = vmul.f32 %v149_v0, %v105_v25  ;;  %v209_v36 = vmul.f32 %v145_v1, %v104_v26  ;;  %v307_v41 = vadd.f32 %v306_v27, %v305_v11  ;;  %v576_v45 = vadd.f32 %v575_v34, %v574_v22  ;;  %v106_v11 = vld [vmem:[#allocation2 + $0x30] sm:$0xff] }
  0xc8   :  { %v507_v51 = vrot.slane %v506_v39, 4  ;;  %v308_v52 = vadd.f32 %v149_v0, %v145_v1  ;;  %v300_v54 = vadd.f32 %v299_v42, %v298_v28  ;;  %v571_v59 = vadd.f32 %v570_v44, %v569_v33 }
  0xc9   :  { %v241_v46 = vsel %vm221_vm1, %v210_v35, 0.0  ;;  %v240_v47 = vsel %vm221_vm1, %v209_v36, 0.0  ;;  %v351_v53 = vmax.f32 %v307_v41, 1e-09  ;;  %v577_v60 = vrot.slane %v576_v45, 2 }
  0xca   :  { %v423_v15 = vpop.permute.xlu1 %422  ;;  %v419_v18 = vpop.permute.xlu0 %418  ;;  %v242_v55 = vadd.f32 %v241_v46, %v240_v47  ;;  %v227_v2 = vrot.slane %v226_v50, 2  ;;  %v508_v3 = vadd.f32 %v507_v51, %v506_v39  ;;  %v309_v4 = vrot.slane %v308_v52, 4 }
  0xcb   :  { %v581_v56 = vadd.f32 %v423_v15, %v419_v18  ;;  %922 = vrcp.f32 %v351_v53  ;;  %v350_v5 = vmax.f32 %v300_v54, 1e-09  ;;  %v484_v1 = vmul.f32 %v423_v15, %v379_v61 }
  0xcc   :  { %v243_v0 = vrot.slane %v242_v55, 4  ;;  %v483_v8 = vmul.f32 %v419_v18, %v378_v62  ;;  %v500_v12 = vrot.slane %v499_v58, 2  ;;  %v572_v13 = vrot.slane %v571_v59, 1  ;;  %v380_v62 = vld [vmem:[#allocation5 + $0x30] sm:$0xff] }
  0xcd   :  { %v582_v9 = vrot.slane %v581_v56, 4  ;;  %v578_v14 = vadd.f32 %v577_v60, %v576_v45  ;;  %v237_v16 = vadd.f32 %v236_v63, %v235_v49  ;;  %v228_v17 = vadd.f32 %v227_v2, %v226_v50  ;;  %v381_v50 = vld [vmem:[#allocation5 + $0x38] sm:$0xff] }
  0xce   :  { %v160_v31 = vpop.permute.xlu1 %159  ;;  %v156_v40 = vpop.permute.xlu0 %155  ;;  %v509_v19 = vrot.slane %v508_v3, 2  ;;  %v310_v20 = vadd.f32 %v309_v4, %v308_v52  ;;  %924 = vrcp.f32 %v350_v5  ;;  %v244_v25 = vadd.f32 %v243_v0, %v242_v55 }
  0xcf   :  { %v315_v6 = vadd.f32 %v160_v31, %v156_v40  ;;  %v212_v22 = vmul.f32 %v160_v31, %v107_v10  ;;  %v211_v23 = vmul.f32 %v156_v40, %v106_v11  ;;  %v514_v15 = vsel %vm221_vm1, %v484_v1, 0.0  ;;  %v109_v1 = vld [vmem:[#allocation2 + $0x48] sm:$0xff] }
  0xd0   :  { %v513_v18 = vsel %vm221_vm1, %v483_v8, 0.0  ;;  %v583_v26 = vadd.f32 %v582_v9, %v581_v56  ;;  %v501_v27 = vadd.f32 %v500_v12, %v499_v58  ;;  %v573_v28 = vadd.f32 %v572_v13, %v571_v59  ;;  %v108_v8 = vld [vmem:[#allocation2 + $0x40] sm:$0xff] }
  0xd1   :  { %v316_v24 = vrot.slane %v315_v6, 4  ;;  %v579_v29 = vrot.slane %v578_v14, 1  ;;  %v238_v32 = vrot.slane %v237_v16, 1  ;;  %v510_v33 = vadd.f32 %v509_v19, %v508_v3 }
  0xd2   :  { %v1187_v48 = vpop.permute.xlu1 %433  ;;  %v1189_v57 = vpop.permute.xlu0 %429  ;;  %v311_v34 = vrot.slane %v310_v20, 2  ;;  %v515_v31 = vadd.f32 %v514_v15, %v513_v18  ;;  %v250_v36 = vsel %vm221_vm1, %v212_v22, 0.0  ;;  %v249_v37 = vsel %vm221_vm1, %v211_v23, 0.0 }
  0xd3   :  { %v588_v35 = vadd.f32 %v1187_v48, %v1189_v57  ;;  %v317_v38 = vadd.f32 %v316_v24, %v315_v6  ;;  %v229_v39 = vrot.slane %v228_v17, 1  ;;  %v245_v40 = vrot.slane %v244_v25, 2 }
  0xd4   :  { %v584_v41 = vrot.slane %v583_v26, 2  ;;  %v502_v44 = vrot.slane %v501_v27, 1  ;;  %v623_v45 = vmax.f32 %v573_v28, 1e-09  ;;  %v580_v46 = vadd.f32 %v579_v29, %v578_v14  ;;  %v382_v28 = vld [vmem:[#allocation5 + $0x40] sm:$0xff] }
  0xd5   :  { %v312_v47 = vadd.f32 %v311_v34, %v310_v20  ;;  %v251_v49 = vadd.f32 %v250_v36, %v249_v37  ;;  %v589_v51 = vrot.slane %v588_v35, 4  ;;  %v239_v52 = vadd.f32 %v238_v32, %v237_v16 }
  0xd6   :  { %v1191_v7 = vpop.permute.xlu1 %170  ;;  %v1193_v21 = vpop.permute.xlu0 %166  ;;  %v511_v53 = vrot.slane %v510_v33, 1  ;;  %v516_v54 = vrot.slane %v515_v31, 4  ;;  %v318_v55 = vrot.slane %v317_v38, 2  ;;  %v230_v59 = vadd.f32 %v229_v39, %v228_v17 }
  0xd7   :  { %v322_v42 = vadd.f32 %v1191_v7, %v1193_v21  ;;  %v246_v60 = vadd.f32 %v245_v40, %v244_v25  ;;  %v585_v61 = vadd.f32 %v584_v41, %v583_v26  ;;  %v1207_v2 = vadd.f32 %v502_v44, %v501_v27  ;;  %v383_v27 = vld [vmem:[#allocation5 + $0x48] sm:$0xff] }
  0xd8   :  { %v923_v58 = vpop.eup %922  ;;  %926 = vrcp.f32 %v623_v45  ;;  %v624_v3 = vmax.f32 %v580_v46, 1e-09  ;;  %v486_v4 = vmul.f32 %v1187_v48, %v381_v50  ;;  %v313_v5 = vrot.slane %v312_v47, 1 }
  0xd9   :  { %v323_v63 = vrot.slane %v322_v42, 4  ;;  %v252_v6 = vrot.slane %v251_v49, 4  ;;  %v590_v0 = vadd.f32 %v589_v51, %v588_v35  ;;  %v1213_v11 = vadd.f32 %v511_v53, %v510_v33 }
  0xda   :  { %v1197_v30 = vpop.permute.xlu1 %444  ;;  %v441_v43 = vpop.permute.xlu0 %440  ;;  %v517_v12 = vadd.f32 %v516_v54, %v515_v31  ;;  %v319_v13 = vadd.f32 %v318_v55, %v317_v38  ;;  %v485_v14 = vmul.f32 %v1189_v57, %v380_v62  ;;  %v361_v17 = vmul.f32 %v923_v58, %v239_v52 }
  0xdb   :  { %v595_v9 = vadd.f32 %v1197_v30, %v441_v43  ;;  %v925_v16 = vpop.eup %924  ;;  %v247_v19 = vrot.slane %v246_v60, 1  ;;  %v586_v20 = vrot.slane %v585_v61, 1  ;;  %v324_v48 = vadd.f32 %v323_v63, %v322_v42 }
  0xdc   :  { %928 = vrcp.f32 %v624_v3  ;;  %v523_v22 = vsel %vm221_vm1, %v486_v4, 0.0  ;;  %v214_v23 = vmul.f32 %v1191_v7, %v109_v1  ;;  %v213_v24 = vmul.f32 %v1193_v21, %v108_v8  ;;  %v111_v3 = vld [vmem:[#allocation2 + $0x58] sm:$0xff]  ;;  %v110_v4 = vld [vmem:[#allocation2 + $0x50] sm:$0xff] }
  0xdd   :  { %v314_v15 = vadd.f32 %v313_v5, %v312_v47  ;;  %v253_v18 = vadd.f32 %v252_v6, %v251_v49  ;;  %v591_v26 = vrot.slane %v590_v0, 2  ;;  %v596_v57 = vrot.slane %v595_v9, 4 }
  0xde   :  { %v1205_v56 = vpop.permute.xlu1 %181  ;;  %v1211_v10 = vpop.permute.xlu0 %177  ;;  %v1221_v29 = vmul.f32 %v925_v16, %v230_v59  ;;  %v518_v32 = vrot.slane %v517_v12, 2  ;;  %v320_v33 = vrot.slane %v319_v13, 1  ;;  %v522_v34 = vsel %vm221_vm1, %v485_v14, 0.0  ;;  %v113_v16 = vld [vmem:[#allocation2 + $0x68] sm:$0xff] }
  0xdf   :  { %v648_v35 = vpack.c.bf16 %v361_v17, %v361_v17  ;;  %v1224_v31 = vadd.f32 %v247_v19, %v246_v60  ;;  %v587_v7 = vadd.f32 %v586_v20, %v585_v61  ;;  %v325_v36 = vrot.slane %v324_v48, 2  ;;  %v112_v17 = vld [vmem:[#allocation2 + $0x60] sm:$0xff] }
  0xe0   :  { %v259_v37 = vsel %vm221_vm1, %v214_v23, 0.0  ;;  %v258_v38 = vsel %vm221_vm1, %v213_v24, 0.0  ;;  %v488_v39 = vmul.f32 %v1197_v30, %v383_v27  ;;  %v487_v40 = vmul.f32 %v441_v43, %v382_v28 }
  0xe1   :  { %v524_v41 = vadd.f32 %v523_v22, %v522_v34  ;;  %v592_v42 = vadd.f32 %v591_v26, %v590_v0  ;;  %v597_v44 = vadd.f32 %v596_v57, %v595_v9  ;;  %v329_v45 = vadd.f32 %v1205_v56, %v1211_v10  ;;  %v385_v57 = vld [vmem:[#allocation5 + $0x58] sm:$0xff] }
  0xe2   :  { %v1219_v25 = vpop.permute.xlu1 %455  ;;  %v1226_v21 = vpop.permute.xlu0 %451  ;;  %v647_v46 = vpack.c.bf16 %v1221_v29, %v1221_v29  ;;  %v352_v47 = vmax.f32 %v314_v15, 1e-09  ;;  %v254_v49 = vrot.slane %v253_v18, 2  ;;  %v321_v50 = vadd.f32 %v320_v33, %v319_v13 }
  0xe3   :  { %v1235_v52 = vadd.f32 %v518_v32, %v517_v12  ;;  %v260_v53 = vadd.f32 %v259_v37, %v258_v38  ;;  %v326_v54 = vadd.f32 %v325_v36, %v324_v48  ;;  %v330_v55 = vrot.slane %v329_v45, 4  ;;  %v384_v32 = vld [vmem:[#allocation5 + $0x50] sm:$0xff] }
  0xe4   :  { %v625_v30 = vmax.f32 %v587_v7, 1e-09  ;;  %v532_v43 = vsel %vm221_vm1, %v488_v39, 0.0  ;;  %v531_v58 = vsel %vm221_vm1, %v487_v40, 0.0  ;;  %v602_v59 = vadd.f32 %v1219_v25, %v1226_v21 }
  0xe5   :  { %v1241_v60 = vpop.eup %926  ;;  %v525_v61 = vrot.slane %v524_v41, 4  ;;  %v593_v62 = vrot.slane %v592_v42, 1  ;;  %v598_v63 = vrot.slane %v597_v44, 2  ;;  %v331_v5 = vadd.f32 %v330_v55, %v329_v45  ;;  %v387_v45 = vld [vmem:[#allocation5 + $0x68] sm:$0xff] }
  0xe6   :  { %v193_v51 = vpop.permute.xlu1 %192  ;;  %v189_v6 = vpop.permute.xlu0 %188  ;;  %v1243_v0 = vunpack.c.l.b16 %v648_v35  ;;  %930 = vrcp.f32 %v352_v47  ;;  %v353_v1 = vmax.f32 %v321_v50, 1e-09  ;;  %v603_v8 = vrot.slane %v602_v59, 4  ;;  %v386_v47 = vld [vmem:[#allocation5 + $0x60] sm:$0xff] }
  0xe7   :  { %v261_v9 = vrot.slane %v260_v53, 4  ;;  %v327_v12 = vrot.slane %v326_v54, 1  ;;  %v533_v13 = vadd.f32 %v532_v43, %v531_v58  ;;  %v332_v14 = vrot.slane %v331_v5, 2 }
  0xe8   :  { %v1245_v19 = vadd.f32 %v254_v49, %v253_v18  ;;  %v216_v20 = vmul.f32 %v1205_v56, %v111_v3  ;;  %v215_v48 = vmul.f32 %v1211_v10, %v110_v4  ;;  %v604_v22 = vadd.f32 %v603_v8, %v602_v59 }
  0xe9   :  { %v1249_v24 = vpop.eup %928  ;;  %932 = vrcp.f32 %v625_v30  ;;  %v1251_v15 = vadd.f32 %v525_v61, %v524_v41  ;;  %v594_v26 = vadd.f32 %v593_v62, %v592_v42  ;;  %v599_v27 = vadd.f32 %v598_v63, %v597_v44 }
  0xea   :  { %v467_v23 = vpop.permute.xlu1 %466  ;;  %v333_v28 = vadd.f32 %v332_v14, %v331_v5  ;;  %v218_v33 = vmul.f32 %v193_v51, %v113_v16  ;;  %v217_v34 = vmul.f32 %v189_v6, %v112_v17  ;;  %v336_v18 = vadd.f32 %v193_v51, %v189_v6  ;;  %v463_v7 = vpop.permute.xlu0 %462 }
  0xeb   :  { %934 = vrcp.f32 %v353_v1  ;;  %v1253_v35 = vadd.f32 %v261_v9, %v260_v53  ;;  %v328_v56 = vadd.f32 %v327_v12, %v326_v54  ;;  %v534_v10 = vrot.slane %v533_v13, 4 }
  0xec   :  { %v268_v36 = vsel %vm221_vm1, %v216_v20, 0.0  ;;  %v267_v37 = vsel %vm221_vm1, %v215_v48, 0.0  ;;  %v605_v38 = vrot.slane %v604_v22, 2  ;;  %v337_v39 = vrot.slane %v336_v18, 4  ;;  %v114_v20 = vld [vmem:[#allocation2 + $0x70] sm:$0xff] }
  0xed   :  { %v626_v40 = vmax.f32 %v594_v26, 1e-09  ;;  %v600_v41 = vrot.slane %v599_v27, 1  ;;  %v490_v42 = vmul.f32 %v1219_v25, %v385_v57  ;;  %v489_v44 = vmul.f32 %v1226_v21, %v384_v32  ;;  %v115_v21 = vld [vmem:[#allocation2 + $0x78] sm:$0xff] }
  0xee   :  { %v334_v49 = vrot.slane %v333_v28, 1  ;;  %v277_v50 = vsel %vm221_vm1, %v218_v33, 0.0  ;;  %v276_v51 = vsel %vm221_vm1, %v217_v34, 0.0  ;;  %v338_v53 = vadd.f32 %v337_v39, %v336_v18  ;;  %v204_v54 = vpop.permute.xlu1 %203  ;;  %v200_v5 = vpop.permute.xlu0 %199 }
  0xef   :  { %v527_v55 = vrot.slane %v1251_v15, 2  ;;  %v263_v30 = vrot.slane %v1253_v35, 2  ;;  %v354_v43 = vmax.f32 %v328_v56, 1e-09  ;;  %v269_v58 = vadd.f32 %v268_v36, %v267_v37 }
  0xf0   :  { %v606_v59 = vadd.f32 %v605_v38, %v604_v22  ;;  %v339_v61 = vrot.slane %v338_v53, 2  ;;  %v492_v25 = vmul.f32 %v467_v23, %v387_v45  ;;  %v491_v62 = vmul.f32 %v463_v7, %v386_v47 }
  0xf1   :  { %936 = vrcp.f32 %v626_v40  ;;  %v1263_v63 = vadd.f32 %v534_v10, %v533_v13  ;;  %v1265_v3 = vadd.f32 %v600_v41, %v599_v27  ;;  %v278_v4 = vadd.f32 %v277_v50, %v276_v51  ;;  %v389_v27 = vld [vmem:[#allocation5 + $0x78] sm:$0xff]  ;;  %v388_v40 = vld [vmem:[#allocation5 + $0x70] sm:$0xff] }
  0xf2   :  { %v335_v6 = vadd.f32 %v334_v49, %v333_v28  ;;  %v541_v1 = vsel %vm221_vm1, %v490_v42, 0.0  ;;  %v540_v8 = vsel %vm221_vm1, %v489_v44, 0.0  ;;  %v340_v9 = vadd.f32 %v339_v61, %v338_v53  ;;  %v478_v28 = vpop.permute.xlu1 %477  ;;  %v474_v41 = vpop.permute.xlu0 %473 }
  0xf3   :  { %v1269_v12 = vpop.eup %930  ;;  %938 = vrcp.f32 %v354_v43  ;;  %v270_v14 = vrot.slane %v269_v58, 4  ;;  %v609_v16 = vadd.f32 %v467_v23, %v463_v7  ;;  %v220_v17 = vmul.f32 %v204_v54, %v115_v21 }
  0xf4   :  { %v607_v48 = vrot.slane %v606_v59, 1  ;;  %v341_v13 = vrot.slane %v340_v9, 1  ;;  %v550_v22 = vsel %vm221_vm1, %v492_v25, 0.0  ;;  %v549_v26 = vsel %vm221_vm1, %v491_v62, 0.0 }
  0xf5   :  { %v627_v57 = vmax.f32 %v1265_v3, 1e-09  ;;  %v542_v32 = vadd.f32 %v541_v1, %v540_v8  ;;  %v279_v33 = vrot.slane %v278_v4, 4  ;;  %v610_v34 = vrot.slane %v609_v16, 4 }
  0xf6   :  { %v1274_v18 = vpop.eup %932  ;;  %v355_v56 = vmax.f32 %v335_v6, 1e-09  ;;  %v342_v10 = vadd.f32 %v341_v13, %v340_v9  ;;  %v219_v23 = vmul.f32 %v200_v5, %v114_v20  ;;  %v343_v7 = vadd.f32 %v204_v54, %v200_v5 }
  0xf7   :  { %v551_v36 = vadd.f32 %v550_v22, %v549_v26  ;;  %v611_v37 = vadd.f32 %v610_v34, %v609_v16  ;;  %v286_v38 = vsel %vm221_vm1, %v220_v17, 0.0  ;;  %v494_v39 = vmul.f32 %v478_v28, %v389_v27 }
  0xf8   :  { %v1277_v42 = vpop.eup %934  ;;  %v271_v44 = vadd.f32 %v270_v14, %v269_v58  ;;  %v608_v45 = vadd.f32 %v607_v48, %v606_v59  ;;  %v285_v47 = vsel %vm221_vm1, %v219_v23, 0.0  ;;  %v344_v49 = vrot.slane %v343_v7, 4 }
  0xf9   :  { %v543_v50 = vrot.slane %v542_v32, 4  ;;  %v280_v51 = vadd.f32 %v279_v33, %v278_v4  ;;  %v356_v53 = vmax.f32 %v342_v10, 1e-09  ;;  %v612_v43 = vrot.slane %v611_v37, 2 }
  0xfa   :  { %v287_v61 = vadd.f32 %v286_v38, %v285_v47  ;;  %v345_v54 = vadd.f32 %v344_v49, %v343_v7  ;;  %v493_v25 = vmul.f32 %v474_v41, %v388_v40  ;;  %v616_v62 = vadd.f32 %v478_v28, %v474_v41 }
  0xfb   :  { %940 = vrcp.f32 %v355_v56  ;;  %v552_v21 = vrot.slane %v551_v36, 4  ;;  %v613_v3 = vadd.f32 %v612_v43, %v611_v37  ;;  %v559_v5 = vsel %vm221_vm1, %v494_v39, 0.0 }
  0xfc   :  { %v628_v6 = vmax.f32 %v608_v45, 1e-09  ;;  %v346_v1 = vrot.slane %v345_v54, 2  ;;  %v558_v58 = vsel %vm221_vm1, %v493_v25, 0.0  ;;  %v617_v59 = vrot.slane %v616_v62, 4 }
  0xfd   :  { %v272_v8 = vrot.slane %v271_v44, 2  ;;  %v544_v9 = vadd.f32 %v543_v50, %v542_v32  ;;  %942 = vrcp.f32 %v356_v53  ;;  %v614_v4 = vrot.slane %v613_v3, 1 }
  0xfe   :  { %v1282_v14 = vpop.eup %936  ;;  %v288_v16 = vrot.slane %v287_v61, 4  ;;  %v347_v17 = vadd.f32 %v346_v1, %v345_v54  ;;  %v560_v20 = vadd.f32 %v559_v5, %v558_v58  ;;  %v618_v48 = vadd.f32 %v617_v59, %v616_v62 }
  0xff   :  { %944 = vrcp.f32 %v627_v57  ;;  %v281_v13 = vrot.slane %v280_v51, 2  ;;  %v553_v22 = vadd.f32 %v552_v21, %v551_v36  ;;  %v615_v26 = vadd.f32 %v614_v4, %v613_v3 }
 0x100   :  { %v939_v27 = vpop.eup %938  ;;  %v264_v28 = vadd.f32 %v263_v30, %v1253_v35  ;;  %946 = vrcp.f32 %v628_v6  ;;  %v348_v33 = vrot.slane %v347_v17, 1  ;;  %v619_v32 = vrot.slane %v618_v48, 2 }
 0x101   :  { %v536_v34 = vrot.slane %v1263_v63, 2  ;;  %v273_v56 = vadd.f32 %v272_v8, %v271_v44  ;;  %v545_v10 = vrot.slane %v544_v9, 2  ;;  %v629_v23 = vmax.f32 %v615_v26, 1e-09 }
 0x102   :  { %v289_v7 = vadd.f32 %v288_v16, %v287_v61  ;;  %v349_v37 = vadd.f32 %v348_v33, %v347_v17  ;;  %v561_v38 = vrot.slane %v560_v20, 4  ;;  %v620_v57 = vadd.f32 %v619_v32, %v618_v48 }
 0x103   :  { %v256_v36 = vrot.slane %v1245_v19, 1  ;;  %v282_v39 = vadd.f32 %v281_v13, %v280_v51  ;;  %v554_v40 = vrot.slane %v553_v22, 2  ;;  %948 = vrcp.f32 %v629_v23 }
 0x104   :  { %v520_v41 = vrot.slane %v1235_v52, 1  ;;  %v528_v35 = vadd.f32 %v527_v55, %v1251_v15  ;;  %v357_v30 = vmax.f32 %v349_v37, 1e-09  ;;  %v621_v45 = vrot.slane %v620_v57, 1 }
 0x105   :  { %v265_v44 = vrot.slane %v264_v28, 1  ;;  %v537_v47 = vadd.f32 %v536_v34, %v1263_v63  ;;  %v274_v49 = vrot.slane %v273_v56, 1  ;;  %v546_v50 = vadd.f32 %v545_v10, %v544_v9 }
 0x106   :  { %v290_v53 = vrot.slane %v289_v7, 2  ;;  %950 = vrcp.f32 %v357_v30  ;;  %v562_v43 = vadd.f32 %v561_v38, %v560_v20  ;;  %v622_v61 = vadd.f32 %v621_v45, %v620_v57 }
 0x107   :  { %v676_v51 = vunpack.c.l.b16 %v647_v46  ;;  %v257_v54 = vadd.f32 %v256_v36, %v1245_v19  ;;  %v283_v25 = vrot.slane %v282_v39, 1  ;;  %v555_v62 = vadd.f32 %v554_v40, %v553_v22 }
 0x108   :  { %v941_v15 = vpop.eup %940  ;;  %v363_v55 = vmul.f32 %v1269_v12, %v1224_v31  ;;  %v521_v63 = vadd.f32 %v520_v41, %v1235_v52  ;;  %v529_v21 = vrot.slane %v528_v35, 1  ;;  %v630_v3 = vmax.f32 %v622_v61, 1e-09 }
 0x109   :  { %v365_v5 = vmul.f32 %v1277_v42, %v257_v54  ;;  %v266_v6 = vadd.f32 %v265_v44, %v264_v28  ;;  %v538_v1 = vrot.slane %v537_v47, 1  ;;  %v275_v58 = vadd.f32 %v274_v49, %v273_v56 }
 0x10a   :  { %v943_v29 = vpop.eup %942  ;;  %v547_v46 = vrot.slane %v546_v50, 1  ;;  %v291_v19 = vadd.f32 %v290_v53, %v289_v7  ;;  %v563_v59 = vrot.slane %v562_v43, 2  ;;  %952 = vrcp.f32 %v630_v3 }
 0x10b   :  { %v634_v8 = vmul.f32 %v1249_v24, %v1213_v11  ;;  %v367_v9 = vmul.f32 %v939_v27, %v266_v6  ;;  %v284_v31 = vadd.f32 %v283_v25, %v282_v39  ;;  %v556_v12 = vrot.slane %v555_v62, 1 }
 0x10c   :  { %v945_v52 = vpop.eup %944  ;;  %v632_v42 = vmul.f32 %v1241_v60, %v1207_v2  ;;  %v649_v4 = vpack.c.bf16 %v363_v55, %v363_v55  ;;  %v530_v16 = vadd.f32 %v529_v21, %v528_v35  ;;  %v369_v17 = vmul.f32 %v941_v15, %v275_v58 }
 0x10d   :  { %v947_v20 = vpop.eup %946  ;;  %v636_v48 = vmul.f32 %v1274_v18, %v521_v63  ;;  %v650_v13 = vpack.c.bf16 %v365_v5, %v365_v5  ;;  %v539_v22 = vadd.f32 %v538_v1, %v537_v47  ;;  %v371_v26 = vmul.f32 %v943_v29, %v284_v31 }
 0x10e   :  { %v638_v11 = vmul.f32 %v1282_v14, %v530_v16  ;;  %v548_v24 = vadd.f32 %v547_v46, %v546_v50  ;;  %v292_v27 = vrot.slane %v291_v19, 1  ;;  %v564_v28 = vadd.f32 %v563_v59, %v562_v43 }
 0x10f   :  { %v743_v33 = vpack.c.bf16 %v634_v8, %v634_v8  ;;  %v651_v32 = vpack.c.bf16 %v367_v9, %v367_v9  ;;  %v640_v34 = vmul.f32 %v945_v52, %v539_v22  ;;  %v557_v2 = vadd.f32 %v556_v12, %v555_v62 }
 0x110   :  { %v949_v60 = vpop.eup %948  ;;  %v742_v56 = vpack.c.bf16 %v632_v42, %v632_v42  ;;  %v652_v10 = vpack.c.bf16 %v369_v17, %v369_v17  ;;  %v642_v23 = vmul.f32 %v947_v20, %v548_v24  ;;  %v678_v7 = vunpack.c.l.b16 %v649_v4  ;;  %v883_v20 = vld [vmem:[%s1343_s5] ss:$0 sm:$0xff] }
 0x111   :  { %v744_v18 = vpack.c.bf16 %v636_v48, %v636_v48  ;;  %v653_v37 = vpack.c.bf16 %v371_v26, %v371_v26  ;;  %v644_v38 = vmul.f32 %v949_v60, %v557_v2  ;;  %v679_v57 = vunpack.c.l.b16 %v650_v13  ;;  %v885_v13 = vld [vmem:[%s1345_s7] ss:$0 sm:$0xff] }
 0x112   :  { %v745_v36 = vpack.c.bf16 %v638_v11, %v638_v11  ;;  %v293_v39 = vadd.f32 %v292_v27, %v291_v19  ;;  %v565_v14 = vrot.slane %v564_v28, 1  ;;  %v685_v41 = vsel %vm684_vm2, %v1243_v0, %v676_v51 }
 0x113   :  { %v951_v40 = vpop.eup %950  ;;  %v772_v35 = vunpack.c.l.b16 %v743_v33  ;;  %v680_v30 = vunpack.c.l.b16 %v651_v32  ;;  %v746_v45 = vpack.c.bf16 %v640_v34, %v640_v34  ;;  %v771_v44 = vunpack.c.l.b16 %v742_v56 }
 0x114   :  { %v681_v47 = vunpack.c.l.b16 %v652_v10  ;;  %v747_v49 = vpack.c.bf16 %v642_v23, %v642_v23  ;;  %v373_v50 = vmul.f32 %v951_v40, %v293_v39  ;;  %v687_v53 = vsel %vm686_vm3, %v678_v7, %v685_v41 }
 0x115   :  { %v773_v43 = vunpack.c.l.b16 %v744_v18  ;;  %v682_v61 = vunpack.c.l.b16 %v653_v37  ;;  %v748_v54 = vpack.c.bf16 %v644_v38, %v644_v38  ;;  %v774_v25 = vunpack.c.l.b16 %v745_v36 }
 0x116   :  { %v566_v62 = vadd.f32 %v565_v14, %v564_v28  ;;  %v654_v15 = vpack.c.bf16 %v373_v50, %v373_v50  ;;  %v689_v55 = vsel %vm688_vm4, %v679_v57, %v687_v53  ;;  %v779_v0 = vsel %vm684_vm2, %v772_v35, %v771_v44  ;;  %v834_v57 = vld [vmem:[%s1346_s8] sm:$0xff]  ;;  %s1096_s8 = smov [#allocation11]  }
 0x117   :  { %v953_v63 = vpop.eup %952  ;;  %v775_v51 = vunpack.c.l.b16 %v746_v45  ;;  %v691_v21 = vsel %vm690_vm5, %v680_v30, %v689_v55  ;;  %v776_v3 = vunpack.c.l.b16 %v747_v49  ;;  %v780_v58 = vsel %vm686_vm3, %v773_v43, %v779_v0  ;;  %s872_s15 = sshll.u32 %s1096_s8, 4  ;;  %s873_s15 = int_to_ptr.vmem [resolvable:$true] %s872_s15 }
 0x118   :  { %v646_v5 = vmul.f32 %v953_v63, %v566_v62  ;;  %v683_v6 = vunpack.c.l.b16 %v654_v15  ;;  %v693_v1 = vsel %vm692_vm6, %v681_v47, %v691_v21  ;;  %v777_v29 = vunpack.c.l.b16 %v748_v54  ;;  %s1058_s16 = scalar_lea.vmem %s873_s15, 128  ;;  %p1063_p12 = scmp.lt.s32.totalorder %s873_s15, %s873_s15 }
 0x119   :  { %v695_v46 = vsel %vm694_vm7, %v682_v61, %v693_v1  ;;  %v781_v8 = vsel %vm688_vm4, %v774_v25, %v780_v58  ;;  %v1095_v60 = vmov 0   ;;  %p1059_p11 = scmp.ne.s32.totalorder %s873_s15, %s1058_s16  ;;  %p1064_p13 = scmp.lt.s32.totalorder %s1058_s16, %s1058_s16 }
 0x11a   :  { %v697_v19 = vsel %vm696_vm8, %v683_v6, %v695_v46  ;;  %v749_v59 = vpack.c.bf16 %v646_v5, %v646_v5  ;;  %v782_v31 = vsel %vm690_vm5, %v775_v51, %v781_v8  ;;  %920 = vset.pattern.permute.xlu1 %v1095_v60  ;;  %921 = vset.pattern.permute.xlu0 %v1095_v60 }
 0x11b   :  { %v698_v9 = vpack.c.b16 %v697_v19, %v697_v19  ;;  %v783_v52 = vsel %vm692_vm6, %v776_v3, %v782_v31  ;;  %p1065_p0 = por %p1064_p13, %p1063_p12 }
 0x11c   :  { %v778_v12 = vunpack.c.l.b16 %v749_v59  ;;  %v784_v42 = vsel %vm694_vm7, %v777_v29, %v783_v52 }
 0x11d   :  { %898 = vmatmul.mubr.msk.bf16.vlgmr.msra.gmra.mxu0 %vm221_vm1, %v698_v9  ;;  %p1066_p1 = pnand %p1065_p0, %p1059_p11 }
 0x11e   :  { %v785_v4 = vsel %vm696_vm8, %v778_v12, %v784_v42 }
 0x11f   :  { %v786_v16 = vpack.c.b16 %v785_v4, %v785_v4 }
 0x121   :  { %906 = vmatmul.mubr.msk.bf16.vlgmr.msra.gmra.mxu1 %vm221_vm1, %v786_v16 }
 0x1dd   :  { %v736_v17 = vpop.f32.mrf.mxu0 }
 0x1de   :  { %v737_v11 = vadd.f32 %v883_v20, %v736_v17 }
 0x1df   :  { %v899_v48 = vpop.f32.mrf.mxu0 }
 0x1e1   :  { %v739_v22 = vpop.f32.mrf.mxu0  ;;  %v824_v26 = vpop.f32.mrf.mxu1 }
 0x1e2   :  { %v825_v24 = vadd.f32 %v885_v13, %v824_v26 }
 0x1e3   :  { %v900_v27 = vpop.f32.mrf.mxu0  ;;  %v907_v28 = vpop.f32.mrf.mxu1 }
 0x1e4   :  { %v830_v33 = vmul.f32 %v825_v24, %v737_v11 }
 0x1e5   :  { %v827_v32 = vpop.f32.mrf.mxu1 }
 0x1e6   :  { %v831_v34 = vsel %vm221_vm1, %v830_v33, 0.0 }
 0x1e7   :  { %v908_v2 = vpop.f32.mrf.mxu1  ;;  %832 = vadd.xlane.f32.xlu0 %v831_v34 }
 0x270   :  { %v833_v56 = vpop.xlane.xlu0 %832 }
 0x271   :  { %v838_v10 = vand.u32 2147483647, %v833_v56  ;;  %v835_v39 = vmax.f32 %v833_v56, 0.0  ;;  %v836_v14 = vmul.f32 %v834_v57, %v833_v56 }
 0x273   :  { %v839_v23 = vsub.f32 0.0, %v838_v10  ;;  %v837_v45 = vsub.f32 %v835_v39, %v836_v14 }
 0x275   :  { %v840_v7 = vmul.f32 1.442695, %v839_v23 }
 0x277   :  { %954 = vpow2.f32 %v840_v7 }
 0x284   :  { %v955_v18 = vpop.eup %954 }
 0x285   :  { %v842_v37 = vadd.f32 1.0, %v955_v18  ;;  %v845_v38 = vmul.f32 -0.5, %v955_v18  ;;  %v848_v40 = vand.u32 2147483647, %v955_v18 }
 0x287   :  { %956 = vlog2.f32 %v842_v37  ;;  %v846_v36 = vadd.f32 1.0, %v845_v38  ;;  %vm849_vm9 = vcmp.lt.f32.partialorder %v848_v40, 0.0004427343 }
 0x289   :  { %v847_v30 = vmul.f32 %v955_v18, %v846_v36 }
 0x294   :  { %v957_v41 = vpop.eup %956 }
 0x295   :  { %v844_v35 = vmul.f32 0.6931472, %v957_v41 }
 0x297   :  { %v850_v44 = vsel %vm849_vm9, %v847_v30, %v844_v35 }
 0x298   :  { %v851_v47 = vadd.f32 %v850_v44, %v837_v45 }
 0x29a   :  { %v853_v49 = vsel %vm852_vm10, %v851_v47, 0.0 }
 0x29b   :  { %v854_v50 = vrot.slane %v853_v49, 4 }
 0x29d   :  { %v855_v53 = vadd.f32 %v854_v50, %v853_v49 }
 0x29f   :  { %v856_v43 = vrot.slane %v855_v53, 2 }
 0x2a1   :  { %v857_v61 = vadd.f32 %v856_v43, %v855_v53 }
 0x2a3   :  { %v858_v54 = vrot.slane %v857_v61, 1 }
 0x2a5   :  { %v859_v25 = vadd.f32 %v858_v54, %v857_v61 }
 0x2a7   :  { %862 = vperm.xlu1 %920, %v859_v25  }
 0x322   :  { %v863_v62 = vpop.permute.xlu1 %862 }
 0x323   :  { %865 = vst [vmem:[#allocation11] sm:$0xff] %v863_v62 }
 0x324   :  { %1069 = shalt.err (!%p1066_p1)
}
 0x325   :  { %875 = dma.vmem_to_hbm [thread:$0]  %s873_s15, 128, %s1347_s9, [#allocation4]  }
 0x326   :  { %1084 = dma.done.wait [#allocation4], 128  }
 0x327   :  { %1085 = vsyncadd [#allocation4], 4294967168 }
 0x328   :  { %879 = vsyncpa [#allocation3], 1 }
 0x329   :  { %880 = vsyncpa [#allocation6], 1 }
 0x32a   :  { %881 = vsyncpa [#allocation9], 1 }
 0x32b   :  { %882 = vsyncpa [#allocation4], 1 }

</bundles_post_ra>
